<compile_context>
chip_gen: v7x
topology: tpu7x:2x2x1
jax: 0.10.0
libtpu: 0.0.40
codegen_flags: <defaults>
</compile_context>

<pallas_src>
import jax
import jax.numpy as jnp
from jax import lax
from jax.experimental import pallas as pl
from jax.experimental.pallas import tpu as pltpu

BN_EPS = 1e-5
LANE = 128


def _gdisc_kernel(x1_ref, x2_ref, w1a_ref, w1b_ref, w2_ref, bn_ref, o_ref):
    x1 = x1_ref[...].astype(jnp.float32)                      # (N, H)
    x2 = x2_ref[...].astype(jnp.float32)                      # (N, H)
    bn = bn_ref[...]                                          # (4, Hp)
    n = x1.shape[0]
    inv_n = 1.0 / float(n)

    # fc1 (no bias): fused concat -> split contraction over the two halves.
    h1 = jnp.dot(x1, w1a_ref[...], preferred_element_type=jnp.float32)
    h1 = h1 + jnp.dot(x2, w1b_ref[...], preferred_element_type=jnp.float32)  # (N, Hp)

    # bn1 (training-mode batch statistics, biased variance), one-pass stats.
    s1 = jnp.sum(h1, axis=0, keepdims=True)
    ss1 = jnp.sum(h1 * h1, axis=0, keepdims=True)
    m1 = s1 * inv_n
    v1 = jnp.maximum(ss1 * inv_n - m1 * m1, 0.0)
    scale1 = lax.rsqrt(v1 + BN_EPS) * bn[0:1, :]
    h1 = (h1 - m1) * scale1 + bn[1:2, :]

    # relu1
    h1 = jnp.maximum(h1, 0.0)

    # fc2 (no bias)
    h2 = jnp.dot(h1, w2_ref[...], preferred_element_type=jnp.float32)        # (N, Hp)

    # bn2 (BatchNorm1dNoBias: same forward math, bias just not trained)
    s2 = jnp.sum(h2, axis=0, keepdims=True)
    ss2 = jnp.sum(h2 * h2, axis=0, keepdims=True)
    m2 = s2 * inv_n
    v2 = jnp.maximum(ss2 * inv_n - m2 * m2, 0.0)
    scale2 = lax.rsqrt(v2 + BN_EPS) * bn[2:3, :]
    out = (h2 - m2) * scale2 + bn[3:4, :]

    o_ref[...] = out.astype(o_ref.dtype)


def g_discriminator_forward(in_1, in_2, params):
    """params: dict with w1a/w1b (H,Hp), w2p (Hp,Hp), bn (4,Hp)."""
    n, h = in_1.shape
    hp = params["w1a"].shape[1]

    flops = 2 * n * h * hp * 2 + 2 * n * hp * hp
    bytes_accessed = 4 * (2 * n * h + 2 * h * hp + hp * hp + 4 * hp + n * hp)

    vmem_spec = pl.BlockSpec(memory_space=pltpu.MemorySpace.VMEM)
    out_padded = pl.pallas_call(
        _gdisc_kernel,
        out_shape=jax.ShapeDtypeStruct((n, hp), jnp.float32),
        in_specs=[vmem_spec] * 6,
        out_specs=vmem_spec,
        cost_estimate=pl.CostEstimate(
            flops=flops, transcendentals=2 * hp, bytes_accessed=bytes_accessed),
    )(in_1, in_2, params["w1a"], params["w1b"], params["w2p"], params["bn"])

    # lane-dense kernel output; slice the padded features off outside.
    return out_padded[:, :h]


def init_params(key, hidden_size):
    """Deterministic synthetic init (PyTorch-like shapes; BN gamma=1, beta=0).

    Weights are pre-transposed, split for the fused concat, and lane-padded
    to a multiple of 128 once here (not per call).
    """
    k1, k2 = jax.random.split(key)
    # nn.Linear default: U(-1/sqrt(fan_in), 1/sqrt(fan_in))
    bound1 = 1.0 / jnp.sqrt(2.0 * hidden_size)
    bound2 = 1.0 / jnp.sqrt(1.0 * hidden_size)
    w1 = jax.random.uniform(k1, (hidden_size, 2 * hidden_size),
                            minval=-bound1, maxval=bound1, dtype=jnp.float32)
    w2 = jax.random.uniform(k2, (hidden_size, hidden_size),
                            minval=-bound2, maxval=bound2, dtype=jnp.float32)

    hp = ((hidden_size + LANE - 1) // LANE) * LANE
    pad = hp - hidden_size

    w1t = w1.T                                               # (2H, H)
    w2t = w2.T                                               # (H, H)
    # Split W1T for the fused concat; zero-pad output features to Hp lanes.
    w1a = jnp.pad(w1t[:hidden_size], ((0, 0), (0, pad)))     # (H, Hp)
    w1b = jnp.pad(w1t[hidden_size:], ((0, 0), (0, pad)))     # (H, Hp)
    # Zero-pad both dims of W2T: padded h1 columns are 0 and padded output
    # columns stay 0, so real features are unaffected.
    w2p = jnp.pad(w2t, ((0, pad), (0, pad)))                 # (Hp, Hp)

    gamma = jnp.pad(jnp.ones((hidden_size,), jnp.float32), (0, pad))
    beta = jnp.zeros((hp,), jnp.float32)
    # rows: g1, b1, g2, b2  (gamma=0 in the pad region keeps padded cols at 0)
    bn = jnp.stack([gamma, beta, gamma, beta], axis=0)       # (4, Hp)

    return {
        "w1a": w1a, "w1b": w1b, "w2p": w2p, "bn": bn, "h": hidden_size,
        # unpadded copies for the pure-JAX reference
        "w1t": w1t, "w2t": w2t,
        "g1": jnp.ones((1, hidden_size), jnp.float32),
        "b1": jnp.zeros((1, hidden_size), jnp.float32),
        "g2": jnp.ones((1, hidden_size), jnp.float32),
        "b2": jnp.zeros((1, hidden_size), jnp.float32),      # frozen in torch
    }


def _reference_forward(in_1, in_2, p):
    x = jnp.concatenate([in_1, in_2], axis=-1)
    h1 = x @ p["w1t"]
    m1 = h1.mean(0, keepdims=True)
    v1 = ((h1 - m1) ** 2).mean(0, keepdims=True)
    h1 = (h1 - m1) / jnp.sqrt(v1 + BN_EPS) * p["g1"] + p["b1"]
    h1 = jnp.maximum(h1, 0.0)
    h2 = h1 @ p["w2t"]
    m2 = h2.mean(0, keepdims=True)
    v2 = ((h2 - m2) ** 2).mean(0, keepdims=True)
    return (h2 - m2) / jnp.sqrt(v2 + BN_EPS) * p["g2"] + p["b2"]


if __name__ == "__main__":
    hidden_size = 32
    batch = 8

    key = jax.random.PRNGKey(0)
    k_in1, k_in2, k_par = jax.random.split(key, 3)
    in_1 = jax.random.normal(k_in1, (batch, hidden_size), dtype=jnp.float32)
    in_2 = jax.random.normal(k_in2, (batch, hidden_size), dtype=jnp.float32)
    params = init_params(k_par, hidden_size)

    fwd = jax.jit(g_discriminator_forward)
    out = fwd(in_1, in_2, params)
    out = jax.block_until_ready(out)

    ref = _reference_forward(in_1, in_2, params)
    assert out.shape == (batch, hidden_size)
    assert jnp.allclose(out, ref, atol=1e-4, rtol=1e-4)

    print("KERNEL_OK")
</pallas_src>

<mosaic_0001>
module attributes {stable_mosaic.version = 11 : i64} {
  func.func @_gdisc_kernel(%arg0: memref<8x32xf32, #tpu.memory_space<vmem>>, %arg1: memref<8x32xf32, #tpu.memory_space<vmem>>, %arg2: memref<32x128xf32, #tpu.memory_space<vmem>>, %arg3: memref<32x128xf32, #tpu.memory_space<vmem>>, %arg4: memref<128x128xf32, #tpu.memory_space<vmem>>, %arg5: memref<4x128xf32, #tpu.memory_space<vmem>>, %arg6: memref<8x128xf32, #tpu.memory_space<vmem>>) attributes {dimension_semantics = [], scalar_prefetch = 0 : i64, scratch_operands = 0 : i64, tpu.core_type = #tpu.core_type<tc>} {
    %c0 = arith.constant 0 : index
    %c0_0 = arith.constant 0 : index
    %0 = vector.load %arg0[%c0, %c0_0] : memref<8x32xf32, #tpu.memory_space<vmem>>, vector<8x32xf32>
    %c0_1 = arith.constant 0 : index
    %c0_2 = arith.constant 0 : index
    %1 = vector.load %arg1[%c0_1, %c0_2] : memref<8x32xf32, #tpu.memory_space<vmem>>, vector<8x32xf32>
    %c0_3 = arith.constant 0 : index
    %c0_4 = arith.constant 0 : index
    %2 = vector.load %arg5[%c0_3, %c0_4] : memref<4x128xf32, #tpu.memory_space<vmem>>, vector<4x128xf32>
    %c0_5 = arith.constant 0 : index
    %c0_6 = arith.constant 0 : index
    %3 = vector.load %arg2[%c0_5, %c0_6] : memref<32x128xf32, #tpu.memory_space<vmem>>, vector<32x128xf32>
    %cst = arith.constant dense<0.000000e+00> : vector<8x128xf32>
    %4 = tpu.matmul %0, %3, %cst {dimension_numbers = #tpu.dot_dimension_numbers<[1], [0], [0], [1], [0, 0, 1, 1], [], []>} : vector<8x32xf32>, vector<32x128xf32>, vector<8x128xf32> -> vector<8x128xf32>
    %c0_7 = arith.constant 0 : index
    %c0_8 = arith.constant 0 : index
    %5 = vector.load %arg3[%c0_7, %c0_8] : memref<32x128xf32, #tpu.memory_space<vmem>>, vector<32x128xf32>
    %cst_9 = arith.constant dense<0.000000e+00> : vector<8x128xf32>
    %6 = tpu.matmul %1, %5, %cst_9 {dimension_numbers = #tpu.dot_dimension_numbers<[1], [0], [0], [1], [0, 0, 1, 1], [], []>} : vector<8x32xf32>, vector<32x128xf32>, vector<8x128xf32> -> vector<8x128xf32>
    %7 = arith.addf %4, %6 : vector<8x128xf32>
    %cst_10 = arith.constant dense<0.000000e+00> : vector<128xf32>
    %8 = vector.multi_reduction <add>, %7, %cst_10 [0] : vector<8x128xf32> to vector<128xf32>
    %9 = vector.shape_cast %8 : vector<128xf32> to vector<1x128xf32>
    %10 = arith.mulf %7, %7 : vector<8x128xf32>
    %cst_11 = arith.constant dense<0.000000e+00> : vector<128xf32>
    %11 = vector.multi_reduction <add>, %10, %cst_11 [0] : vector<8x128xf32> to vector<128xf32>
    %12 = vector.shape_cast %11 : vector<128xf32> to vector<1x128xf32>
    %cst_12 = arith.constant 1.250000e-01 : f32
    %13 = vector.broadcast %cst_12 : f32 to vector<1x128xf32>
    %14 = arith.mulf %9, %13 : vector<1x128xf32>
    %cst_13 = arith.constant 1.250000e-01 : f32
    %15 = vector.broadcast %cst_13 : f32 to vector<1x128xf32>
    %16 = arith.mulf %12, %15 : vector<1x128xf32>
    %17 = arith.mulf %14, %14 : vector<1x128xf32>
    %18 = arith.subf %16, %17 : vector<1x128xf32>
    %cst_14 = arith.constant 0.000000e+00 : f32
    %19 = vector.broadcast %cst_14 : f32 to vector<1x128xf32>
    %20 = arith.maximumf %18, %19 : vector<1x128xf32>
    %cst_15 = arith.constant 9.99999974E-6 : f32
    %21 = vector.broadcast %cst_15 : f32 to vector<1x128xf32>
    %22 = arith.addf %20, %21 : vector<1x128xf32>
    %23 = math.rsqrt %22 : vector<1x128xf32>
    %24 = vector.extract_strided_slice %2 {offsets = [0, 0], sizes = [1, 128], strides = [1, 1]} : vector<4x128xf32> to vector<1x128xf32>
    %25 = arith.mulf %23, %24 : vector<1x128xf32>
    %26 = vector.broadcast %14 : vector<1x128xf32> to vector<8x128xf32>
    %27 = arith.subf %7, %26 : vector<8x128xf32>
    %28 = vector.broadcast %25 : vector<1x128xf32> to vector<8x128xf32>
    %29 = arith.mulf %27, %28 : vector<8x128xf32>
    %30 = vector.extract_strided_slice %2 {offsets = [1, 0], sizes = [1, 128], strides = [1, 1]} : vector<4x128xf32> to vector<1x128xf32>
    %31 = vector.broadcast %30 : vector<1x128xf32> to vector<8x128xf32>
    %32 = arith.addf %29, %31 : vector<8x128xf32>
    %cst_16 = arith.constant 0.000000e+00 : f32
    %33 = vector.broadcast %cst_16 : f32 to vector<8x128xf32>
    %34 = arith.maximumf %32, %33 : vector<8x128xf32>
    %c0_17 = arith.constant 0 : index
    %c0_18 = arith.constant 0 : index
    %35 = vector.load %arg4[%c0_17, %c0_18] : memref<128x128xf32, #tpu.memory_space<vmem>>, vector<128x128xf32>
    %cst_19 = arith.constant dense<0.000000e+00> : vector<8x128xf32>
    %36 = tpu.matmul %34, %35, %cst_19 {dimension_numbers = #tpu.dot_dimension_numbers<[1], [0], [0], [1], [0, 0, 1, 1], [], []>} : vector<8x128xf32>, vector<128x128xf32>, vector<8x128xf32> -> vector<8x128xf32>
    %cst_20 = arith.constant dense<0.000000e+00> : vector<128xf32>
    %37 = vector.multi_reduction <add>, %36, %cst_20 [0] : vector<8x128xf32> to vector<128xf32>
    %38 = vector.shape_cast %37 : vector<128xf32> to vector<1x128xf32>
    %39 = arith.mulf %36, %36 : vector<8x128xf32>
    %cst_21 = arith.constant dense<0.000000e+00> : vector<128xf32>
    %40 = vector.multi_reduction <add>, %39, %cst_21 [0] : vector<8x128xf32> to vector<128xf32>
    %41 = vector.shape_cast %40 : vector<128xf32> to vector<1x128xf32>
    %cst_22 = arith.constant 1.250000e-01 : f32
    %42 = vector.broadcast %cst_22 : f32 to vector<1x128xf32>
    %43 = arith.mulf %38, %42 : vector<1x128xf32>
    %cst_23 = arith.constant 1.250000e-01 : f32
    %44 = vector.broadcast %cst_23 : f32 to vector<1x128xf32>
    %45 = arith.mulf %41, %44 : vector<1x128xf32>
    %46 = arith.mulf %43, %43 : vector<1x128xf32>
    %47 = arith.subf %45, %46 : vector<1x128xf32>
    %cst_24 = arith.constant 0.000000e+00 : f32
    %48 = vector.broadcast %cst_24 : f32 to vector<1x128xf32>
    %49 = arith.maximumf %47, %48 : vector<1x128xf32>
    %cst_25 = arith.constant 9.99999974E-6 : f32
    %50 = vector.broadcast %cst_25 : f32 to vector<1x128xf32>
    %51 = arith.addf %49, %50 : vector<1x128xf32>
    %52 = math.rsqrt %51 : vector<1x128xf32>
    %53 = vector.extract_strided_slice %2 {offsets = [2, 0], sizes = [1, 128], strides = [1, 1]} : vector<4x128xf32> to vector<1x128xf32>
    %54 = arith.mulf %52, %53 : vector<1x128xf32>
    %55 = vector.broadcast %43 : vector<1x128xf32> to vector<8x128xf32>
    %56 = arith.subf %36, %55 : vector<8x128xf32>
    %57 = vector.broadcast %54 : vector<1x128xf32> to vector<8x128xf32>
    %58 = arith.mulf %56, %57 : vector<8x128xf32>
    %59 = vector.extract_strided_slice %2 {offsets = [3, 0], sizes = [1, 128], strides = [1, 1]} : vector<4x128xf32> to vector<1x128xf32>
    %60 = vector.broadcast %59 : vector<1x128xf32> to vector<8x128xf32>
    %61 = arith.addf %58, %60 : vector<8x128xf32>
    %c0_26 = arith.constant 0 : index
    %c0_27 = arith.constant 0 : index
    %62 = vector.load %arg6[%c0_26, %c0_27] : memref<8x128xf32, #tpu.memory_space<vmem>>, vector<8x128xf32>
    tpu.vector_store %arg6[%c0_26, %c0_27], %61 {strides = array<i32>} : memref<8x128xf32, #tpu.memory_space<vmem>>, vector<8x128xf32>,
    return
  }
}

</mosaic_0001>

<bundles_post_ra>
// kernel: g_discriminator_forward.1
= control target key start
LH: loop header
LB: loop body
LE: loop exit
PB: predicated region body
PF: predicated region fallthrough
CT: control target
= control target key end

     0   :  { %11 = vsyncpa [#allocation3], 0  ;;  %s839_s0 = inlined_call_operand.hbm [shape: f32[8,32], index: 0, kind: input, shape index: {}]   ;;  %s840_s1 = inlined_call_operand.hbm [shape: f32[8,32], index: 1, kind: input, shape index: {}]   ;;  %s841_s2 = inlined_call_operand.hbm [shape: f32[32,128], index: 2, kind: input, shape index: {}]   ;;  %s842_s3 = inlined_call_operand.hbm [shape: f32[32,128], index: 3, kind: input, shape index: {}]   ;;  %s843_s4 = inlined_call_operand.hbm [shape: f32[128,128], index: 4, kind: input, shape index: {}]   ;;  %s844_s5 = inlined_call_operand.vmem [shape: f32[4,128], index: 5, kind: input, shape index: {}]   ;;  %s845_s6 = inlined_call_operand.hbm [shape: f32[8,128], index: 6, kind: output, shape index: {}]  }
   0x1   :  { %12 = vsyncpa [#allocation6], 0 }
   0x2   :  { %13 = vsyncpa [#allocation9], 0 }
   0x3   :  { %14 = vsyncpa [#allocation4], 0  ;;  %s694_s21 = smov [#allocation5]   ;;  %s554_s25 = scalar_lea.hbm %s840_s1, 128 }
   0x4   :  { %s31_s22 = sshll.u32 %s694_s21, 4  ;;  %p555_p0 = scmp.ne.s32.totalorder %s840_s1, %s554_s25  ;;  %s32_s22 = int_to_ptr.vmem [resolvable:$true] %s31_s22 }
   0x5   :  { %p558_p1 = scmp.lt.u32.totalorder %s554_s25, %s840_s1 }
   0x7   :  { %p560_p2 = pnand %p558_p1, %p555_p0 }
   0x9   :  { %563 = shalt.err (!%p560_p2)
}
   0xa   :  { %s564_s30 = scalar_lea.vmem %s32_s22, 128  ;;  %p569_p4 = scmp.lt.s32.totalorder %s32_s22, %s32_s22 }
   0xb   :  { %p565_p3 = scmp.ne.s32.totalorder %s32_s22, %s564_s30  ;;  %p570_p5 = scmp.lt.s32.totalorder %s564_s30, %s564_s30 }
   0xd   :  { %p571_p6 = por %p570_p5, %p569_p4 }
   0xf   :  { %p572_p7 = pnand %p571_p6, %p565_p3 }
  0x11   :  { %575 = shalt.err (!%p572_p7)
}
  0x12   :  { %34 = dma.hbm_to_vmem [thread:$0]  %s840_s1, 128, %s32_s22, [#allocation6]  }
  0x13   :  { %s695_s9 = smov [#allocation8]   ;;  %s696_s11 = smov [#allocation2]  }
  0x14   :  { %s52_s10 = sshll.u32 %s695_s9, 4  ;;  %s21_s12 = sshll.u32 %s696_s11, 4  ;;  %s53_s10 = int_to_ptr.vmem [resolvable:$true] %s52_s10  ;;  %s22_s12 = int_to_ptr.vmem [resolvable:$true] %s21_s12 }
  0x15   :  { %s576_s15 = scalar_lea.hbm %s842_s3, 512 }
  0x16   :  { %p577_p8 = scmp.ne.s32.totalorder %s842_s3, %s576_s15  ;;  %p580_p9 = scmp.lt.u32.totalorder %s576_s15, %s842_s3 }
  0x18   :  { %p582_p10 = pnand %p580_p9, %p577_p8 }
  0x1a   :  { %585 = shalt.err (!%p582_p10)
}
  0x1b   :  { %s586_s1 = scalar_lea.vmem %s53_s10, 512  ;;  %p591_p12 = scmp.lt.s32.totalorder %s53_s10, %s53_s10 }
  0x1c   :  { %p587_p11 = scmp.ne.s32.totalorder %s53_s10, %s586_s1  ;;  %p592_p13 = scmp.lt.s32.totalorder %s586_s1, %s586_s1 }
  0x1e   :  { %p593_p0 = por %p592_p13, %p591_p12 }
  0x20   :  { %p594_p1 = pnand %p593_p0, %p587_p11 }
  0x22   :  { %597 = shalt.err (!%p594_p1)
}
  0x23   :  { %s697_s20 = smov 128   ;;  %s698_s21 = smov 8  }
  0x24   :  { %58 = dma.hbm_to_vmem [thread:$0]  %s842_s3, 512, %s53_s10, [#allocation9], %s697_s20, %s697_s20, %s698_s21  }
  0x25   :  { %s598_s26 = scalar_lea.hbm %s839_s0, 128 }
  0x26   :  { %p599_p2 = scmp.ne.s32.totalorder %s839_s0, %s598_s26  ;;  %p602_p3 = scmp.lt.u32.totalorder %s598_s26, %s839_s0 }
  0x28   :  { %p604_p4 = pnand %p602_p3, %p599_p2 }
  0x2a   :  { %607 = shalt.err (!%p604_p4)
}
  0x2b   :  { %s608_s7 = scalar_lea.vmem %s22_s12, 128  ;;  %p613_p6 = scmp.lt.s32.totalorder %s22_s12, %s22_s12 }
  0x2c   :  { %p609_p5 = scmp.ne.s32.totalorder %s22_s12, %s608_s7  ;;  %p614_p7 = scmp.lt.s32.totalorder %s608_s7, %s608_s7 }
  0x2e   :  { %p615_p8 = por %p614_p7, %p613_p6 }
  0x30   :  { %p616_p9 = pnand %p615_p8, %p609_p5 }
  0x32   :  { %619 = shalt.err (!%p616_p9)
}
  0x33   :  { %24 = dma.hbm_to_vmem [thread:$0]  %s839_s0, 128, %s22_s12, [#allocation3]  }
  0x34   :  { %s699_s9 = smov [#allocation7]   ;;  %s700_s11 = smov [#allocation10]  }
  0x35   :  { %s40_s10 = sshll.u32 %s699_s9, 4  ;;  %s64_s13 = sshll.u32 %s700_s11, 4  ;;  %s41_s10 = int_to_ptr.vmem [resolvable:$true] %s40_s10  ;;  %s65_s13 = int_to_ptr.vmem [resolvable:$true] %s64_s13 }
  0x36   :  { %s620_s16 = scalar_lea.hbm %s841_s2, 512 }
  0x37   :  { %p621_p10 = scmp.ne.s32.totalorder %s841_s2, %s620_s16  ;;  %p624_p11 = scmp.lt.u32.totalorder %s620_s16, %s841_s2 }
  0x39   :  { %p626_p12 = pnand %p624_p11, %p621_p10 }
  0x3b   :  { %629 = shalt.err (!%p626_p12)
}
  0x3c   :  { %s630_s0 = scalar_lea.vmem %s41_s10, 512  ;;  %p635_p0 = scmp.lt.s32.totalorder %s41_s10, %s41_s10 }
  0x3d   :  { %p631_p13 = scmp.ne.s32.totalorder %s41_s10, %s630_s0  ;;  %p636_p1 = scmp.lt.s32.totalorder %s630_s0, %s630_s0 }
  0x3f   :  { %p637_p2 = por %p636_p1, %p635_p0 }
  0x41   :  { %p638_p3 = pnand %p637_p2, %p631_p13 }
  0x43   :  { %641 = shalt.err (!%p638_p3)
}
  0x44   :  { %46 = dma.hbm_to_vmem [thread:$0]  %s841_s2, 512, %s41_s10, [#allocation6], %s697_s20, %s697_s20, %s698_s21  }
  0x45   :  { %s642_s25 = scalar_lea.hbm %s843_s4, 2048 }
  0x46   :  { %p643_p4 = scmp.ne.s32.totalorder %s843_s4, %s642_s25  ;;  %p646_p5 = scmp.lt.u32.totalorder %s642_s25, %s843_s4 }
  0x48   :  { %p648_p6 = pnand %p646_p5, %p643_p4 }
  0x4a   :  { %651 = shalt.err (!%p648_p6)
}
  0x4b   :  { %s652_s30 = scalar_lea.vmem %s65_s13, 2048  ;;  %p657_p8 = scmp.lt.s32.totalorder %s65_s13, %s65_s13 }
  0x4c   :  { %p653_p7 = scmp.ne.s32.totalorder %s65_s13, %s652_s30  ;;  %p658_p9 = scmp.lt.s32.totalorder %s652_s30, %s652_s30 }
  0x4e   :  { %p659_p10 = por %p658_p9, %p657_p8 }
  0x50   :  { %p660_p11 = pnand %p659_p10, %p653_p7 }
  0x52   :  { %663 = shalt.err (!%p660_p11)
}
  0x53   :  { %70 = dma.hbm_to_vmem [thread:$0]  %s843_s4, 2048, %s65_s13, [#allocation9], %s697_s20, %s697_s20, %s698_s21  }
  0x54   :  { %686 = dma.done.wait [#allocation3], 128  }
  0x55   :  { %687 = vsyncadd [#allocation3], 4294967168 }
  0x56   :  { %688 = dma.done.wait [#allocation6], 640  }
  0x57   :  { %689 = vsyncadd [#allocation6], 4294966656 }
  0x58   :  { %690 = dma.done.wait [#allocation9], 2560  }
  0x59   :  { %691 = vsyncadd [#allocation9], 4294964736  ;;  %v701_v0 = vmov 0.0|0.0   ;;  %vm702_vm0 = vmmov 0   ;;  %v703_v1 = vmov 0.0   ;;  %v95_v2 = vld [vmem:[#allocation8] sm:$0xff]  ;;  %v268_v61 = vlaneseq }
  0x5a   :  { %501 = vmatprep.subr.bf16.mxu0 %v701_v0  ;;  %452 = vmatprep.mubr.msk.f32.mxu0 %vm702_vm0, %v703_v1  ;;  %v96_v3 = vld [vmem:[#allocation8 + $0x8] sm:$0xff]  ;;  %v97_v4 = vld [vmem:[#allocation8 + $0x10] sm:$0xff]  ;;  %v98_v6 = vld [vmem:[#allocation8 + $0x18] sm:$0xff]  ;;  %vm99_vm1 = vcmask 261120  }
  0x5b   :  { %513 = vmatprep.subr.bf16.mxu1 %v701_v0  ;;  %498 = vmatprep.mubr.msk.f32.mxu1 %vm702_vm0, %v703_v1  ;;  %v502_v5 = vpack.c.bf16 %v96_v3, %v95_v2  ;;  %v505_v7 = vpack.c.bf16 %v98_v6, %v97_v4  ;;  %v91_v8 = vld [vmem:[#allocation7] sm:$0xff]  ;;  %v92_v9 = vld [vmem:[#allocation7 + $0x8] sm:$0xff]  ;;  %v89_v10 = vld [vmem:[#allocation5] sm:$0xff]  ;;  %v269_v62 = vshrl.u32 %v268_v61, 7 }
  0x5c   :  { %v508_v11 = vpack.c.bf16 %v92_v9, %v91_v8  ;;  %v93_v12 = vld [vmem:[#allocation7 + $0x10] sm:$0xff]  ;;  %v94_v13 = vld [vmem:[#allocation7 + $0x18] sm:$0xff]  ;;  %v279_v16 = vld [vmem:[#allocation10] sm:$0xff] }
  0x5d   :  { %503 = vmatpush3.bf16.msra.mxu0 %v502_v5  ;;  %v511_v14 = vpack.c.bf16 %v94_v13, %v93_v12  ;;  %v88_v15 = vld [vmem:[#allocation2] sm:$0xff]  ;;  %v280_v17 = vld [vmem:[#allocation10 + $0x8] sm:$0xff]  ;;  %v282_v20 = vld [vmem:[#allocation10 + $0x18] sm:$0xff] }
  0x5e   :  { %504 = vmatprep.subr.bf16.mxu0 %v701_v0  ;;  %v514_v18 = vpack.c.bf16 %v280_v17, %v279_v16  ;;  %v281_v19 = vld [vmem:[#allocation10 + $0x10] sm:$0xff]  ;;  %v283_v22 = vld [vmem:[#allocation10 + $0x20] sm:$0xff]  ;;  %v284_v23 = vld [vmem:[#allocation10 + $0x28] sm:$0xff] }
  0x5f   :  { %v517_v21 = vpack.c.bf16 %v282_v20, %v281_v19  ;;  %v520_v24 = vpack.c.bf16 %v284_v23, %v283_v22  ;;  %v285_v25 = vld [vmem:[#allocation10 + $0x30] sm:$0xff]  ;;  %v286_v26 = vld [vmem:[#allocation10 + $0x38] sm:$0xff]  ;;  %v287_v28 = vld [vmem:[#allocation10 + $0x40] sm:$0xff] }
  0x60   :  { %515 = vmatpush3.bf16.msra.mxu1 %v514_v18  ;;  %v523_v27 = vpack.c.bf16 %v286_v26, %v285_v25  ;;  %v288_v29 = vld [vmem:[#allocation10 + $0x48] sm:$0xff]  ;;  %v289_v31 = vld [vmem:[#allocation10 + $0x50] sm:$0xff]  ;;  %v290_v32 = vld [vmem:[#allocation10 + $0x58] sm:$0xff] }
  0x61   :  { %506 = vmatpush3.bf16.msra.mxu0 %v505_v7  ;;  %516 = vmatprep.subr.bf16.mxu1 %v701_v0  ;;  %v526_v30 = vpack.c.bf16 %v288_v29, %v287_v28  ;;  %v529_v33 = vpack.c.bf16 %v290_v32, %v289_v31  ;;  %v291_v34 = vld [vmem:[#allocation10 + $0x60] sm:$0xff]  ;;  %v292_v35 = vld [vmem:[#allocation10 + $0x68] sm:$0xff]  ;;  %v293_v37 = vld [vmem:[#allocation10 + $0x70] sm:$0xff]  ;;  %v389_v31 = vsub.s32 2, %v269_v62  ;;  %v394_v32 = vsub.s32 3, %v269_v62 }
  0x62   :  { %507 = vmatprep.subr.bf16.mxu0 %v701_v0  ;;  %v532_v36 = vpack.c.bf16 %v292_v35, %v291_v34  ;;  %v294_v38 = vld [vmem:[#allocation10 + $0x78] sm:$0xff]  ;;  %v90_v63 = vld [vmem:[%s844_s5] sm:$0xf]  ;;  %s704_s5 = smov [#allocation11]  }
  0x63   :  { %v535_v39 = vpack.c.bf16 %v294_v38, %v293_v37  ;;  %v395_v37 = vrot.slane %v90_v63, %v394_v32  ;;  %s404_s21 = sshll.u32 %s704_s5, 4  ;;  %s405_s21 = int_to_ptr.vmem [resolvable:$true] %s404_s21 }
  0x64   :  { %453 = vmatmul.mubr.msk.f32.vlgmr.msra.gmra.mrb[0].mxu0 %vm99_vm1, %v89_v10  ;;  %518 = vmatpush3.bf16.msra.mxu1 %v517_v21  ;;  %s664_s3 = scalar_lea.vmem %s405_s21, 128  ;;  %p669_p13 = scmp.lt.s32.totalorder %s405_s21, %s405_s21 }
  0x65   :  { %509 = vmatpush3.bf16.msra.mxu0 %v508_v11  ;;  %463 = vmatprep.mubr.msk.f32.mxu0 %vm702_vm0, %v703_v1  ;;  %v275_v1 = vsub.s32 1, %v269_v62  ;;  %p665_p12 = scmp.ne.s32.totalorder %s405_s21, %s664_s3  ;;  %p670_p0 = scmp.lt.s32.totalorder %s664_s3, %s664_s3 }
  0x66   :  { %510 = vmatprep.subr.bf16.mxu0 %v701_v0  ;;  %519 = vmatprep.subr.bf16.mxu1 %v701_v0 }
  0x67   :  { %v276_v6 = vrot.slane %v90_v63, %v275_v1  ;;  %p671_p1 = por %p670_p0, %p669_p13 }
  0x68   :  { %521 = vmatpush3.bf16.msra.mxu1 %v520_v24 }
  0x69   :  { %512 = vmatpush3.bf16.msra.mxu0 %v511_v14  ;;  %522 = vmatprep.subr.bf16.mxu1 %v701_v0  ;;  %p672_p2 = pnand %p671_p1, %p665_p12 }
  0x6c   :  { %464 = vmatmul.mubr.msk.f32.vlgmr.msra.gmra.mrb[0].mxu0 %vm99_vm1, %v88_v15  ;;  %524 = vmatpush3.bf16.msra.mxu1 %v523_v27 }
  0x6d   :  { %525 = vmatprep.subr.bf16.mxu1 %v701_v0 }
  0x70   :  { %527 = vmatpush3.bf16.msra.mxu1 %v526_v30 }
  0x71   :  { %528 = vmatprep.subr.bf16.mxu1 %v701_v0 }
  0x74   :  { %530 = vmatpush3.bf16.msra.mxu1 %v529_v33 }
  0x75   :  { %531 = vmatprep.subr.bf16.mxu1 %v701_v0 }
  0x78   :  { %533 = vmatpush3.bf16.msra.mxu1 %v532_v36 }
  0x79   :  { %534 = vmatprep.subr.bf16.mxu1 %v701_v0  ;;  %v270_v0 = vsub.s32 0, %v269_v62 }
  0x7c   :  { %536 = vmatpush3.bf16.msra.mxu1 %v535_v39 }
 0x13f   :  { %v242_v40 = vpop.f32.mrb[0].mxu0 }
 0x140   :  { %v246_v41 = vrot.slane %v242_v40, 4  ;;  %v252_v42 = vmul.f32 %v242_v40, %v242_v40  ;;  %v465_v43 = vpop.f32.mrb[1].mxu0 }
 0x142   :  { %v247_v44 = vadd.f32 %v246_v41, %v242_v40  ;;  %v253_v45 = vrot.slane %v252_v42, 4 }
 0x144   :  { %v248_v46 = vrot.slane %v247_v44, 2  ;;  %v254_v47 = vadd.f32 %v253_v45, %v252_v42 }
 0x146   :  { %v249_v48 = vadd.f32 %v248_v46, %v247_v44  ;;  %v255_v49 = vrot.slane %v254_v47, 2 }
 0x148   :  { %v250_v50 = vrot.slane %v249_v48, 1  ;;  %v256_v51 = vadd.f32 %v255_v49, %v254_v47 }
 0x14a   :  { %v251_v52 = vadd.f32 %v250_v50, %v249_v48  ;;  %v257_v53 = vrot.slane %v256_v51, 1 }
 0x14c   :  { %v258_v54 = vadd.f32 %v257_v53, %v256_v51  ;;  %v259_v55 = vmul.f32 0.125, %v251_v52 }
 0x14e   :  { %v260_v56 = vmul.f32 0.125, %v258_v54  ;;  %v261_v57 = vmul.f32 %v259_v55, %v259_v55  ;;  %v267_v4 = vsub.f32 %v242_v40, %v259_v55 }
 0x150   :  { %v262_v58 = vsub.f32 %v260_v56, %v261_v57 }
 0x152   :  { %v263_v59 = vmax.f32 %v262_v58, 0.0 }
 0x154   :  { %v264_v60 = vadd.f32 1e-05, %v263_v59 }
 0x156   :  { %550 = vrsqrt.f32 %v264_v60 }
 0x160   :  { %v551_v2 = vpop.eup %550 }
 0x161   :  { %v266_v3 = vmul.f32 %v551_v2, %v90_v63 }
 0x163   :  { %v271_v5 = vrot.slane %v266_v3, %v270_v0 }
 0x165   :  { %v272_v7 = vmul.f32 %v271_v5, %v267_v4 }
 0x167   :  { %v277_v8 = vadd.f32 %v276_v6, %v272_v7 }
 0x169   :  { %v278_v9 = vmax.f32 %v277_v8, 0.0 }
 0x16b   :  { %499 = vmatmul.mubr.f32.vlgmr.msra.gmra.mrb[0].mxu1 %v278_v9 }
 0x23e   :  { %v361_v10 = vpop.f32.mrb[0].mxu1 }
 0x23f   :  { %v365_v11 = vrot.slane %v361_v10, 4  ;;  %v371_v12 = vmul.f32 %v361_v10, %v361_v10  ;;  %v500_v13 = vpop.f32.mrb[1].mxu1 }
 0x241   :  { %v366_v14 = vadd.f32 %v365_v11, %v361_v10  ;;  %v372_v15 = vrot.slane %v371_v12, 4 }
 0x243   :  { %v367_v16 = vrot.slane %v366_v14, 2  ;;  %v373_v17 = vadd.f32 %v372_v15, %v371_v12 }
 0x245   :  { %v368_v18 = vadd.f32 %v367_v16, %v366_v14  ;;  %v374_v19 = vrot.slane %v373_v17, 2 }
 0x247   :  { %v369_v20 = vrot.slane %v368_v18, 1  ;;  %v375_v21 = vadd.f32 %v374_v19, %v373_v17 }
 0x249   :  { %v370_v22 = vadd.f32 %v369_v20, %v368_v18  ;;  %v376_v23 = vrot.slane %v375_v21, 1 }
 0x24b   :  { %v377_v24 = vadd.f32 %v376_v23, %v375_v21  ;;  %v378_v25 = vmul.f32 0.125, %v370_v22 }
 0x24d   :  { %v379_v26 = vmul.f32 0.125, %v377_v24  ;;  %v380_v27 = vmul.f32 %v378_v25, %v378_v25  ;;  %v386_v35 = vsub.f32 %v361_v10, %v378_v25 }
 0x24f   :  { %v381_v28 = vsub.f32 %v379_v26, %v380_v27 }
 0x251   :  { %v382_v29 = vmax.f32 %v381_v28, 0.0 }
 0x253   :  { %v383_v30 = vadd.f32 1e-05, %v382_v29 }
 0x255   :  { %552 = vrsqrt.f32 %v383_v30 }
 0x25f   :  { %v553_v33 = vpop.eup %552 }
 0x260   :  { %v385_v34 = vmul.f32 %v553_v33, %v90_v63 }
 0x262   :  { %v390_v36 = vrot.slane %v385_v34, %v389_v31 }
 0x264   :  { %v391_v38 = vmul.f32 %v390_v36, %v386_v35 }
 0x266   :  { %v396_v39 = vadd.f32 %v395_v37, %v391_v38 }
 0x268   :  { %397 = vst [vmem:[#allocation11] sm:$0xff] %v396_v39 }
 0x269   :  { %675 = shalt.err (!%p672_p2)
}
 0x26a   :  { %s676_s10 = scalar_lea.hbm %s845_s6, 128 }
 0x26b   :  { %p677_p3 = scmp.ne.s32.totalorder %s845_s6, %s676_s10  ;;  %p680_p4 = scmp.lt.u32.totalorder %s676_s10, %s845_s6 }
 0x26d   :  { %p682_p5 = pnand %p680_p4, %p677_p3 }
 0x26f   :  { %685 = shalt.err (!%p682_p5)
}
 0x270   :  { %407 = dma.vmem_to_hbm [thread:$0]  %s405_s21, 128, %s845_s6, [#allocation4]  }
 0x271   :  { %692 = dma.done.wait [#allocation4], 128  }
 0x272   :  { %693 = vsyncadd [#allocation4], 4294967168 }
 0x273   :  { %411 = vsyncpa [#allocation3], 1 }
 0x274   :  { %412 = vsyncpa [#allocation6], 1 }
 0x275   :  { %413 = vsyncpa [#allocation9], 1 }
 0x276   :  { %414 = vsyncpa [#allocation4], 1 }

</bundles_post_ra>
